<compile_context>
chip_gen: v7x
topology: tpu7x:2x2x1
jax: 0.10.0
libtpu: 0.0.40
codegen_flags: <defaults>
</compile_context>

<pallas_src>
import functools

import jax
import jax.numpy as jnp
from jax.experimental import pallas as pl
from jax.experimental.pallas import tpu as pltpu


def _round_up(x, m):
    return ((x + m - 1) // m) * m


# ---------------------------------------------------------------------------
# Fused GEMM Pallas kernel:  out = act((x @ w) [* scale] + bias [+ residual])
#   grid = (M tiles, K tiles);  K axis is a reduction ("arbitrary", last)
#   accumulated in an f32 VMEM scratch, finalized on the last K step.
# ---------------------------------------------------------------------------
def _gemm_kernel(*refs, relu, has_scale, has_residual):
    x_ref, w_ref = refs[0], refs[1]
    idx = 2
    scale_ref = None
    if has_scale:
        scale_ref = refs[idx]
        idx += 1
    bias_ref = refs[idx]
    idx += 1
    res_ref = None
    if has_residual:
        res_ref = refs[idx]
        idx += 1
    o_ref, acc_ref = refs[idx], refs[idx + 1]

    k = pl.program_id(1)

    @pl.when(k == 0)
    def _():
        acc_ref[...] = jnp.zeros_like(acc_ref)

    acc_ref[...] += jnp.dot(x_ref[...], w_ref[...],
                            preferred_element_type=jnp.float32)

    @pl.when(k == pl.num_programs(1) - 1)
    def _():
        acc = acc_ref[...]
        if has_scale:
            acc = acc * scale_ref[...]
        acc = acc + bias_ref[...]
        if has_residual:
            acc = acc + res_ref[...].astype(jnp.float32)
        if relu:
            acc = jnp.maximum(acc, 0.0)
        o_ref[...] = acc.astype(o_ref.dtype)


def _choose_tk(K, Np):
    """Pick a K tile so the bf16 weight block stays ~<=2 MiB (x2 buffers)."""
    budget = 2 * 1024 * 1024
    if K * Np * 2 <= budget or K < 256:
        return K, K                       # single K step, no padding needed
    Kp = _round_up(K, 128)
    tk = 128
    for cand in range(256, Kp + 1, 128):
        if Kp % cand == 0 and cand * Np * 2 <= budget:
            tk = cand
    return Kp, tk


def fused_gemm(x, w, bias, scale=None, residual=None, relu=False,
               out_dtype=jnp.bfloat16):
    """out = act((x @ w) [* scale] + bias [+ residual]); x:[M,K], w:[K,N]."""
    M, K = x.shape
    N = w.shape[1]
    Np = _round_up(N, 128)                # lane-dense output slab
    Kp, tk = _choose_tk(K, Np)
    tm = max(8, min(256, _round_up(M, 8)))
    Mp = _round_up(M, tm)

    xb = x.astype(jnp.bfloat16)
    wb = w.astype(jnp.bfloat16)
    if Mp != M or Kp != K:
        xb = jnp.pad(xb, ((0, Mp - M), (0, Kp - K)))
    if Kp != K or Np != N:
        wb = jnp.pad(wb, ((0, Kp - K), (0, Np - N)))
    bias2 = jnp.pad(bias.astype(jnp.float32), (0, Np - N)).reshape(1, Np)

    in_arrays = [xb, wb]
    in_specs = [
        pl.BlockSpec((tm, tk), lambda i, k: (i, k)),
        pl.BlockSpec((tk, Np), lambda i, k: (k, 0)),
    ]

    has_scale = scale is not None
    if has_scale:
        scale2 = jnp.pad(scale.astype(jnp.float32), (0, Np - N)).reshape(1, Np)
        in_arrays.append(scale2)
        in_specs.append(pl.BlockSpec((1, Np), lambda i, k: (0, 0)))

    in_arrays.append(bias2)
    in_specs.append(pl.BlockSpec((1, Np), lambda i, k: (0, 0)))

    has_residual = residual is not None
    if has_residual:
        resb = residual.astype(jnp.bfloat16)
        if Mp != M or Np != N:
            resb = jnp.pad(resb, ((0, Mp - M), (0, Np - N)))
        in_arrays.append(resb)
        in_specs.append(pl.BlockSpec((tm, Np), lambda i, k: (i, 0)))

    out = pl.pallas_call(
        functools.partial(_gemm_kernel, relu=relu, has_scale=has_scale,
                          has_residual=has_residual),
        out_shape=jax.ShapeDtypeStruct((Mp, Np), out_dtype),
        grid=(Mp // tm, Kp // tk),
        in_specs=in_specs,
        out_specs=pl.BlockSpec((tm, Np), lambda i, k: (i, 0)),
        scratch_shapes=[pltpu.VMEM((tm, Np), jnp.float32)],
        compiler_params=pltpu.CompilerParams(
            dimension_semantics=("parallel", "arbitrary")),
    )(*in_arrays)

    if Mp != M or Np != N:
        out = out[:M, :N]
    return out


# ---------------------------------------------------------------------------
# Pooling kernels (gridded over rows so only a tile is VMEM-resident)
# ---------------------------------------------------------------------------
def _maxpool_kernel(p_ref, o_ref):
    o_ref[...] = jnp.max(p_ref[...], axis=1)


def maxpool_patches(patches):
    """patches: [M, KK, C] -> max over KK -> [M, C]."""
    M, KK, C = patches.shape
    tm = max(8, min(256, _round_up(M, 8)))
    Mp = _round_up(M, tm)
    if Mp != M:
        patches = jnp.pad(patches, ((0, Mp - M), (0, 0), (0, 0)))
    out = pl.pallas_call(
        _maxpool_kernel,
        out_shape=jax.ShapeDtypeStruct((Mp, C), patches.dtype),
        grid=(Mp // tm,),
        in_specs=[pl.BlockSpec((tm, KK, C), lambda i: (i, 0, 0))],
        out_specs=pl.BlockSpec((tm, C), lambda i: (i, 0)),
        compiler_params=pltpu.CompilerParams(
            dimension_semantics=("parallel",)),
    )(patches)
    return out[:M]


def _avgpool_kernel(x_ref, o_ref):
    o_ref[...] = jnp.mean(x_ref[...].astype(jnp.float32), axis=1)


def global_avgpool(x):
    """x: [B, HW, C] -> mean over HW -> [B, C] (f32)."""
    B, HW, C = x.shape
    tb = max(8, min(64, _round_up(B, 8)))
    Bp = _round_up(B, tb)
    if Bp != B:
        x = jnp.pad(x, ((0, Bp - B), (0, 0), (0, 0)))
    out = pl.pallas_call(
        _avgpool_kernel,
        out_shape=jax.ShapeDtypeStruct((Bp, C), jnp.float32),
        grid=(Bp // tb,),
        in_specs=[pl.BlockSpec((tb, HW, C), lambda i: (i, 0, 0))],
        out_specs=pl.BlockSpec((tb, C), lambda i: (i, 0)),
        compiler_params=pltpu.CompilerParams(
            dimension_semantics=("parallel",)),
    )(x)
    return out[:B]


# ---------------------------------------------------------------------------
# Plain-JAX glue (im2col, BN folding)
# ---------------------------------------------------------------------------
def im2col(x, kh, kw, stride, pad, pad_value=0.0):
    """x: [B,H,W,C] -> ([B*Ho*Wo, kh*kw*C], Ho, Wo)."""
    B, H, W, C = x.shape
    xp = jnp.pad(x, ((0, 0), (pad, pad), (pad, pad), (0, 0)),
                 constant_values=pad_value)
    Ho = (H + 2 * pad - kh) // stride + 1
    Wo = (W + 2 * pad - kw) // stride + 1
    pats = []
    for i in range(kh):
        for j in range(kw):
            pats.append(xp[:, i:i + (Ho - 1) * stride + 1:stride,
                            j:j + (Wo - 1) * stride + 1:stride, :])
    p = jnp.stack(pats, axis=3)                 # [B, Ho, Wo, kh*kw, C]
    return p.reshape(B * Ho * Wo, kh * kw * C), Ho, Wo


def bn_fold(gamma, beta, mean, var, eps=1e-5):
    scale = gamma / jnp.sqrt(var + eps)
    shift = beta - mean * scale
    return scale, shift


def conv_bn(x, w, scale, shift, stride, pad, relu, residual=None):
    """x: [B,H,W,Cin] (bf16), w: [KH,KW,Cin,Cout] -> [B,Ho,Wo,Cout] (bf16)."""
    B, H, W, C = x.shape
    KH, KW, _, Cout = w.shape
    cols, Ho, Wo = im2col(x, KH, KW, stride, pad)
    res2 = None if residual is None else residual.reshape(B * Ho * Wo, Cout)
    out = fused_gemm(cols, w.reshape(KH * KW * C, Cout), shift, scale=scale,
                     residual=res2, relu=relu, out_dtype=jnp.bfloat16)
    return out.reshape(B, Ho, Wo, Cout)


def maxpool2d(x, k=3, stride=2, pad=1):
    B, H, W, C = x.shape
    cols, Ho, Wo = im2col(x, k, k, stride, pad, pad_value=-jnp.inf)
    out = maxpool_patches(cols.reshape(B * Ho * Wo, k * k, C))
    return out.reshape(B, Ho, Wo, C)


# ---------------------------------------------------------------------------
# Parameter init (deterministic, resnet18 shapes)
# ---------------------------------------------------------------------------
def init_params(key, num_classes=10, out_dim=128):
    keys = iter(jax.random.split(key, 40))

    def conv_w(kh, kw, cin, cout):
        fan_in = kh * kw * cin
        return (jax.random.normal(next(keys), (kh, kw, cin, cout), jnp.float32)
                * jnp.sqrt(2.0 / fan_in))

    def bn(c):
        return dict(gamma=jnp.ones((c,), jnp.float32),
                    beta=jnp.zeros((c,), jnp.float32),
                    mean=jnp.zeros((c,), jnp.float32),
                    var=jnp.ones((c,), jnp.float32))

    def linear(cin, cout):
        bound = 1.0 / (cin ** 0.5)
        w = jax.random.uniform(next(keys), (cin, cout), jnp.float32,
                               -bound, bound)
        b = jax.random.uniform(next(keys), (cout,), jnp.float32,
                               -bound, bound)
        return w, b

    def make_block(cin, cout, stride):
        blk = dict(stride=stride,
                   w1=conv_w(3, 3, cin, cout), bn1=bn(cout),
                   w2=conv_w(3, 3, cout, cout), bn2=bn(cout))
        if stride != 1 or cin != cout:
            blk['down_w'] = conv_w(1, 1, cin, cout)
            blk['down_bn'] = bn(cout)
        return blk

    params = dict(stem_w=conv_w(7, 7, 3, 64), stem_bn=bn(64))

    stages = []
    cin = 64
    for cout, stride in [(64, 1), (128, 2), (256, 2), (512, 2)]:
        blocks = [make_block(cin, cout, stride), make_block(cout, cout, 1)]
        stages.append(blocks)
        cin = cout
    params['stages'] = stages

    dim_mlp = 512
    params['cls_w'], params['cls_b'] = linear(dim_mlp, num_classes)
    params['con_w1'], params['con_b1'] = linear(dim_mlp, dim_mlp)
    params['con_w2'], params['con_b2'] = linear(dim_mlp, out_dim)
    return params


# ---------------------------------------------------------------------------
# Forward pass (ResNetSimCLR)
# ---------------------------------------------------------------------------
def resnet_simclr_forward(params, x_nchw):
    x = jnp.transpose(x_nchw, (0, 2, 3, 1)).astype(jnp.bfloat16)  # NCHW->NHWC

    # Stem: conv7x7/s2 + BN + ReLU, maxpool3x3/s2
    s, b = bn_fold(**params['stem_bn'])
    x = conv_bn(x, params['stem_w'], s, b, stride=2, pad=3, relu=True)
    x = maxpool2d(x, k=3, stride=2, pad=1)

    # Residual stages (resnet18 BasicBlocks)
    for stage in params['stages']:
        for blk in stage:
            identity = x
            if 'down_w' in blk:
                ds, db = bn_fold(**blk['down_bn'])
                identity = conv_bn(x, blk['down_w'], ds, db,
                                   stride=blk['stride'], pad=0, relu=False)
            s1, b1 = bn_fold(**blk['bn1'])
            out = conv_bn(x, blk['w1'], s1, b1,
                          stride=blk['stride'], pad=1, relu=True)
            s2, b2 = bn_fold(**blk['bn2'])
            x = conv_bn(out, blk['w2'], s2, b2,
                        stride=1, pad=1, relu=True, residual=identity)

    # AdaptiveAvgPool2d((1,1)) + flatten(1)
    B, H, W, C = x.shape
    feat = global_avgpool(x.reshape(B, H * W, C))          # [B, 512] f32

    # Heads: fuse classify_head and the first contrastive layer into one
    # lane-dense GEMM (N = num_classes + 512, padded to a multiple of 128).
    num_classes = params['cls_w'].shape[1]
    w_heads = jnp.concatenate([params['cls_w'], params['con_w1']], axis=1)
    b_heads = jnp.concatenate([params['cls_b'], params['con_b1']], axis=0)
    head_out = fused_gemm(feat, w_heads, b_heads, relu=False,
                          out_dtype=jnp.float32)
    cla_out = head_out[:, :num_classes]
    # ReLU of the contrastive hidden on a tiny [B, 512] slab (plain JAX).
    h = jnp.maximum(head_out[:, num_classes:], 0.0)

    con_out = fused_gemm(h, params['con_w2'], params['con_b2'],
                         relu=False, out_dtype=jnp.float32)
    return cla_out, con_out


# ---------------------------------------------------------------------------
if __name__ == "__main__":
    key = jax.random.PRNGKey(0)
    k_params, k_input = jax.random.split(key)

    num_classes, out_dim = 10, 128
    params = init_params(k_params, num_classes=num_classes, out_dim=out_dim)

    # Small input: batch=2, 3 channels (resnet stem), 32x32 spatial (NCHW).
    x = jax.random.normal(k_input, (2, 3, 32, 32), jnp.float32)

    cla_out, con_out = resnet_simclr_forward(params, x)
    cla_out = jax.block_until_ready(cla_out)
    con_out = jax.block_until_ready(con_out)

    assert cla_out.shape == (2, num_classes), cla_out.shape
    assert con_out.shape == (2, out_dim), con_out.shape
    assert bool(jnp.all(jnp.isfinite(cla_out))) and bool(jnp.all(jnp.isfinite(con_out)))

    print("KERNEL_OK")
</pallas_src>

<mosaic_0001>
module attributes {stable_mosaic.version = 11 : i64} {
  func.func @_gemm_kernel(%arg0: i32, %arg1: i32, %arg2: memref<256x147xbf16, #tpu.memory_space<vmem>>, %arg3: memref<147x128xbf16, #tpu.memory_space<vmem>>, %arg4: memref<1x128xf32, #tpu.memory_space<vmem>>, %arg5: memref<1x128xf32, #tpu.memory_space<vmem>>, %arg6: memref<256x128xbf16, #tpu.memory_space<vmem>>, %arg7: memref<256x128xf32, #tpu.memory_space<vmem>>) attributes {dimension_semantics = [#tpu.dimension_semantics<parallel>, #tpu.dimension_semantics<arbitrary>], iteration_bounds = array<i64: 2, 1>, scalar_prefetch = 0 : i64, scratch_operands = 1 : i64, tpu.core_type = #tpu.core_type<tc>, window_params = [{transform_indices = @transform_0, window_bounds = array<i64: 256, 147>}, {transform_indices = @transform_1, window_bounds = array<i64: 147, 128>}, {pipeline_mode = #tpu.pipeline_mode<synchronous>, transform_indices = @transform_2, window_bounds = array<i64: 1, 128>}, {pipeline_mode = #tpu.pipeline_mode<synchronous>, transform_indices = @transform_3, window_bounds = array<i64: 1, 128>}, {transform_indices = @transform_4, window_bounds = array<i64: 256, 128>}]} {
    %c0_i32 = arith.constant 0 : i32
    %0 = arith.cmpi eq, %arg1, %c0_i32 : i32
    %1 = arith.extui %0 : i1 to i32
    %c0_i32_0 = arith.constant 0 : i32
    %2 = arith.cmpi ne, %1, %c0_i32_0 : i32
    scf.if %2 {
      %cst_10 = arith.constant 0.000000e+00 : f32
      %12 = vector.broadcast %cst_10 : f32 to vector<256x128xf32>
      %c0_11 = arith.constant 0 : index
      %c0_12 = arith.constant 0 : index
      %13 = vector.load %arg7[%c0_11, %c0_12] : memref<256x128xf32, #tpu.memory_space<vmem>>, vector<256x128xf32>
      tpu.vector_store %arg7[%c0_11, %c0_12], %12 {strides = array<i32>} : memref<256x128xf32, #tpu.memory_space<vmem>>, vector<256x128xf32>,
    } else {
    }
    %c0 = arith.constant 0 : index
    %c0_1 = arith.constant 0 : index
    %3 = vector.load %arg7[%c0, %c0_1] : memref<256x128xf32, #tpu.memory_space<vmem>>, vector<256x128xf32>
    %c0_2 = arith.constant 0 : index
    %c0_3 = arith.constant 0 : index
    %4 = vector.load %arg2[%c0_2, %c0_3] : memref<256x147xbf16, #tpu.memory_space<vmem>>, vector<256x147xbf16>
    %c0_4 = arith.constant 0 : index
    %c0_5 = arith.constant 0 : index
    %5 = vector.load %arg3[%c0_4, %c0_5] : memref<147x128xbf16, #tpu.memory_space<vmem>>, vector<147x128xbf16>
    %cst = arith.constant dense<0.000000e+00> : vector<256x128xf32>
    %6 = tpu.matmul %4, %5, %cst {dimension_numbers = #tpu.dot_dimension_numbers<[1], [0], [0], [1], [0, 0, 1, 1], [], []>} : vector<256x147xbf16>, vector<147x128xbf16>, vector<256x128xf32> -> vector<256x128xf32>
    %7 = arith.addf %3, %6 : vector<256x128xf32>
    %c0_6 = arith.constant 0 : index
    %c0_7 = arith.constant 0 : index
    %8 = vector.load %arg7[%c0_6, %c0_7] : memref<256x128xf32, #tpu.memory_space<vmem>>, vector<256x128xf32>
    tpu.vector_store %arg7[%c0_6, %c0_7], %7 {strides = array<i32>} : memref<256x128xf32, #tpu.memory_space<vmem>>, vector<256x128xf32>,
    %c0_i32_8 = arith.constant 0 : i32
    %9 = arith.cmpi eq, %arg1, %c0_i32_8 : i32
    %10 = arith.extui %9 : i1 to i32
    %c0_i32_9 = arith.constant 0 : i32
    %11 = arith.cmpi ne, %10, %c0_i32_9 : i32
    scf.if %11 {
      %c0_10 = arith.constant 0 : index
      %c0_11 = arith.constant 0 : index
      %12 = vector.load %arg7[%c0_10, %c0_11] : memref<256x128xf32, #tpu.memory_space<vmem>>, vector<256x128xf32>
      %c0_12 = arith.constant 0 : index
      %c0_13 = arith.constant 0 : index
      %13 = vector.load %arg4[%c0_12, %c0_13] : memref<1x128xf32, #tpu.memory_space<vmem>>, vector<1x128xf32>
      %14 = vector.broadcast %13 : vector<1x128xf32> to vector<256x128xf32>
      %15 = arith.mulf %12, %14 : vector<256x128xf32>
      %c0_14 = arith.constant 0 : index
      %c0_15 = arith.constant 0 : index
      %16 = vector.load %arg5[%c0_14, %c0_15] : memref<1x128xf32, #tpu.memory_space<vmem>>, vector<1x128xf32>
      %17 = vector.broadcast %16 : vector<1x128xf32> to vector<256x128xf32>
      %18 = arith.addf %15, %17 : vector<256x128xf32>
      %cst_16 = arith.constant 0.000000e+00 : f32
      %19 = vector.broadcast %cst_16 : f32 to vector<256x128xf32>
      %20 = arith.maximumf %18, %19 : vector<256x128xf32>
      %21 = arith.truncf %20 : vector<256x128xf32> to vector<256x128xbf16>
      %c0_17 = arith.constant 0 : index
      %c0_18 = arith.constant 0 : index
      %22 = vector.load %arg6[%c0_17, %c0_18] : memref<256x128xbf16, #tpu.memory_space<vmem>>, vector<256x128xbf16>
      tpu.vector_store %arg6[%c0_17, %c0_18], %21 {strides = array<i32>} : memref<256x128xbf16, #tpu.memory_space<vmem>>, vector<256x128xbf16>,
    } else {
    }
    return
  }
  func.func @transform_0(%arg0: i32, %arg1: i32) -> (i32, i32) {
    %c0_i32 = arith.constant 0 : i32
    return %arg0, %arg1 : i32, i32
  }
  func.func @transform_1(%arg0: i32, %arg1: i32) -> (i32, i32) {
    %c0_i32 = arith.constant 0 : i32
    %c0_i32_0 = arith.constant 0 : i32
    return %arg1, %c0_i32 : i32, i32
  }
  func.func @transform_2(%arg0: i32, %arg1: i32) -> (i32, i32) {
    %c0_i32 = arith.constant 0 : i32
    %c0_i32_0 = arith.constant 0 : i32
    %c0_i32_1 = arith.constant 0 : i32
    return %c0_i32, %c0_i32_0 : i32, i32
  }
  func.func @transform_3(%arg0: i32, %arg1: i32) -> (i32, i32) {
    %c0_i32 = arith.constant 0 : i32
    %c0_i32_0 = arith.constant 0 : i32
    %c0_i32_1 = arith.constant 0 : i32
    return %c0_i32, %c0_i32_0 : i32, i32
  }
  func.func @transform_4(%arg0: i32, %arg1: i32) -> (i32, i32) {
    %c0_i32 = arith.constant 0 : i32
    %c0_i32_0 = arith.constant 0 : i32
    return %arg0, %c0_i32 : i32, i32
  }
}

</mosaic_0001>

<bundles_post_ra>
// kernel: tpu_custom_call.1
= control target key start
LH: loop header
LB: loop body
LE: loop exit
PB: predicated region body
PF: predicated region fallthrough
CT: control target
= control target key end

     0   :  { %9 = vsyncpa [#allocation4], 0  ;;  %s2038_s0 = inlined_call_operand.vmem [shape: bf16[512,147], index: 0, kind: input, shape index: {}]   ;;  %s2039_s1 = inlined_call_operand.vmem [shape: bf16[147,128], index: 1, kind: input, shape index: {}]   ;;  %s2040_s2 = inlined_call_operand.vmem [shape: f32[1,128], index: 2, kind: input, shape index: {}]   ;;  %s2041_s3 = inlined_call_operand.vmem [shape: f32[1,128], index: 3, kind: input, shape index: {}]   ;;  %s2042_s4 = inlined_call_operand.hbm [shape: bf16[512,128], index: 4, kind: output, shape index: {}]  }
   0x1   :  { %11 = vsyncpa [#allocation4 + $0x1], 0  ;;  %s1747_s15 = smov 0   ;;  %s1749_s16 = smov 0  }
   0x2   :  { %s1751_s17 = smov 0   ;;  %s1753_s18 = smov 0  }
   0x3   :  { %s1755_s19 = smov 0   ;;  %s1757_s20 = smov 0  }
   0x4 LB: > { %s1264_s21 = sadd.s32 4294967295, %s1715_s20   ;;  %s1265_s22 = sadd.s32 4294967294, %s1715_s20   ;;  %s1715_s20 = sphi %s1757_s20, %s17_s20   ;;  %s1711_s19 = sphi %s1755_s19, %s2049_s19   ;;  %s1707_s18 = sphi %s1753_s18, %s2048_s18   ;;  %s1703_s17 = sphi %s1751_s17, %s2047_s17   ;;  %s1699_s16 = sphi %s1749_s16, %s2046_s16   ;;  %s1695_s15 = sphi %s1747_s15, %s2045_s15  }
   0x5   : > { %s29_s23 = sadd.s32 1, %s1711_s19  ;;  %s132_s24 = sadd.s32 1, %s1703_s17 }
   0x6   : > { %p31_p0 = scmp.ge.s32.totalorder %s29_s23, 2  ;;  %p142_p1 = scmp.ne.s32.totalorder %s1703_s17, %s1699_s16 }
   0x7   : > { %p143_p2 = scmp.eq.s32.totalorder %s1264_s21, 1  ;;  %p148_p3 = scmp.ne.s32.totalorder %s1699_s16, %s1695_s15 }
   0x8   : > { %s2051_s23 = smov (%p31_p0, %s29_s23), 0  ;;  %p149_p5 = scmp.eq.s32.totalorder %s1265_s22, 1 }
   0x9   : > { %p1787_p4 = por %p143_p2, %p142_p1  ;;  %s129_s26 = ssub.s32 %s1711_s19, %s2051_s23 }
   0xa   : > { %p1269_p6 = scmp.ge.s32.totalorder %s1715_s20, 1  ;;  %p130_p7 = scmp.eq.s32.totalorder %s129_s26, 0 }
   0xb   : > { %p1794_p8 = por %p149_p5, %p148_p3  ;;  %p197_p9 = scmp.lt.s32.totalorder %s1715_s20, 3 }
   0xc   : > { %s1800_s28 = scalar_select %p130_p7, %s1703_s17, %s132_s24  }
   0xd   : > { %p198_p10 = pnand %p1269_p6, %p197_p9 }
   0xe   : > { %v1579_v0 = vld [vmem:[%s2039_s1] sm:$0xff] (!%p198_p10)   ;;  %v1717_v1 = vmov (!%p198_p10), 0   ;;  %v1580_v2 = vld [vmem:[%s2039_s1 + $0x8] sm:$0xff] (!%p198_p10)   ;;  %v1581_v3 = vld [vmem:[%s2039_s1 + $0x10] sm:$0xff] (!%p198_p10)   ;;  %s1271_s9 = sshll.u32 (!%p198_p10), %s1707_s18, 5  ;;  %vm573_vm0 = vcmask (!%p198_p10), 154624  }
   0xf   : > { %201 = sbr.rel (%p198_p10) target bundleno = 349 (0x15d), region = 36  ;;  %629 = vmatprep.subr.bf16.mxu0 (!%p198_p10), %v1717_v1  ;;  %1500 = vmatprep.subr.bf16.mxu1 (!%p198_p10), %v1717_v1  ;;  %p235_p11 = scmp.lt.s32.totalorder (!%p198_p10), %s1271_s9, 63  ;;  %v1582_v4 = vld [vmem:[%s2039_s1 + $0x18] sm:$0xff] (!%p198_p10)   ;;  %v1583_v5 = vld [vmem:[%s2039_s1 + $0x20] sm:$0xff] (!%p198_p10)   ;;  %v1584_v8 = vld [vmem:[%s2039_s1 + $0x28] sm:$0xff] (!%p198_p10)   ;;  %vm622_vm1 = vcmask (!%p198_p10), 1040384  }
  0x10   : > { %630 = vmatpush1.bf16.msra.mxu0 (!%p198_p10), %v1579_v0  ;;  %1510 = vmatpush1.bf16.msra.mxu1 (!%p198_p10), %v1579_v0  ;;  %v1585_v9 = vld [vmem:[%s2039_s1 + $0x30] sm:$0xff] (!%p198_p10)   ;;  %v1586_v10 = vld [vmem:[%s2039_s1 + $0x38] sm:$0xff] (!%p198_p10)   ;;  %vm623_vm2 = vcmask (!%p198_p10), 1041408   ;;  %v1718_v11 = vmov (!%p198_p10), 65535   ;;  %v1587_v13 = vld [vmem:[%s2039_s1 + $0x40] sm:$0xff] (!%p198_p10)   ;;  %s1404_s29 = sshll.u32 (!%p198_p10), %s1707_s18, 11 }
  0x11   : > { %631 = vmatprep.subr.bf16.mxu0 (!%p198_p10), %v1717_v1  ;;  %1501 = vmatprep.subr.bf16.mxu1 (!%p198_p10), %v1717_v1  ;;  %v624_v12 = vsel (!%p198_p10), %vm622_vm1, 4294967295, %v1718_v11  ;;  %v1588_v14 = vld [vmem:[%s2039_s1 + $0x48] ss:$0 sps:$4 sm:$0x33] (!%p198_p10)   ;;  %v1889_v47 = vld [vmem:[%s2040_s2] ss:$0 sm:$0xff] (!%p198_p10)  ;;  %s1984_s7 = scalar_lea.hbm (!%p198_p10), %s2042_s4, %s1404_s29 }
  0x12   : > { %v625_v15 = vsel (!%p198_p10), %vm623_vm2, %v624_v12, 0  ;;  %v1894_v49 = vld [vmem:[%s2041_s3] ss:$0 sm:$0xff] (!%p198_p10) }
  0x13   : > { %v627_v16 = vand.u32 (!%p198_p10), %v1588_v14, %v625_v15 }
  0x14   : > { %632 = vmatpush1.bf16.msra.mxu0 (!%p198_p10), %v1580_v2  ;;  %1511 = vmatpush1.bf16.msra.mxu1 (!%p198_p10), %v1580_v2 }
  0x15   : > { %633 = vmatprep.subr.bf16.mxu0 (!%p198_p10), %v1717_v1  ;;  %1502 = vmatprep.subr.bf16.mxu1 (!%p198_p10), %v1717_v1 }
  0x16   : > { %s2053_s9 = smov (!%p235_p11, %s1271_s9), 63 }
  0x17   : > { %s1371_s12 = sshll.u32 %s2053_s9, 3  ;;  %s1719_s9 = smov [#allocation3]  }
  0x18   : > { %634 = vmatpush1.bf16.msra.mxu0 %v1581_v3  ;;  %1512 = vmatpush1.bf16.msra.mxu1 %v1581_v3  ;;  %s1818_s21 = scalar_lea.vmem %s2038_s0, %s1371_s12  ;;  %s1641_s10 = sshll.u32 %s1719_s9, 4  ;;  %s1642_s10 = int_to_ptr.vmem [resolvable:$false] %s1641_s10 }
  0x19   : > { %635 = vmatprep.subr.bf16.mxu0 %v1717_v1  ;;  %1503 = vmatprep.subr.bf16.mxu1 %v1717_v1  ;;  %v1591_v6 = vld [vmem:[%s1818_s21 + $0x4] ss:$8 sps:$4 sm:$0xff]   ;;  %v1589_v17 = vld [vmem:[%s1818_s21] ss:$8 sps:$4 sm:$0xff]   ;;  %v1595_v19 = vld [vmem:[%s1818_s21 + $0x14] ss:$8 sps:$4 sm:$0xff]  }
  0x1a   : > { %v1594_v7 = vld [vmem:[%s1818_s21 + $0x84] ss:$8 sps:$4 sm:$0xff]   ;;  %1316 = vmatprep.mubr.msk.bf16.mxu0 %vm573_vm0, %v1591_v6  ;;  %v1592_v18 = vld [vmem:[%s1818_s21 + $0x80] ss:$8 sps:$4 sm:$0xff]   ;;  %v1597_v20 = vld [vmem:[%s1818_s21 + $0x94] ss:$8 sps:$4 sm:$0xff]  }
  0x1b   : > { %1324 = vmatprep.mubr.msk.bf16.mxu1 %vm573_vm0, %v1594_v7  ;;  %v1599_v21 = vld [vmem:[%s1818_s21 + $0x10] ss:$8 sps:$4 sm:$0xff]   ;;  %v1601_v23 = vld [vmem:[%s1818_s21 + $0x24] ss:$8 sps:$4 sm:$0xff]   ;;  %v1605_v25 = vld [vmem:[%s1818_s21 + $0x20] ss:$8 sps:$4 sm:$0xff]  }
  0x1c   : > { %636 = vmatpush1.bf16.msra.mxu0 %v1582_v4  ;;  %1513 = vmatpush1.bf16.msra.mxu1 %v1582_v4  ;;  %v1600_v22 = vld [vmem:[%s1818_s21 + $0x90] ss:$8 sps:$4 sm:$0xff]   ;;  %v1603_v24 = vld [vmem:[%s1818_s21 + $0xa4] ss:$8 sps:$4 sm:$0xff]   ;;  %v1606_v26 = vld [vmem:[%s1818_s21 + $0xa0] ss:$8 sps:$4 sm:$0xff]  }
  0x1d   : > { %637 = vmatprep.subr.bf16.mxu0 %v1717_v1  ;;  %1504 = vmatprep.subr.bf16.mxu1 %v1717_v1  ;;  %v1607_v27 = vld [vmem:[%s1818_s21 + $0x34] ss:$8 sps:$4 sm:$0xff]   ;;  %v1611_v29 = vld [vmem:[%s1818_s21 + $0x30] ss:$8 sps:$4 sm:$0xff]   ;;  %v1613_v31 = vld [vmem:[%s1818_s21 + $0x44] ss:$8 sps:$4 sm:$0xff]  }
  0x1e   : > { %v1609_v28 = vld [vmem:[%s1818_s21 + $0xb4] ss:$8 sps:$4 sm:$0xff]   ;;  %v1612_v30 = vld [vmem:[%s1818_s21 + $0xb0] ss:$8 sps:$4 sm:$0xff]   ;;  %v1615_v32 = vld [vmem:[%s1818_s21 + $0xc4] ss:$8 sps:$4 sm:$0xff]  }
  0x1f   : > { %v1617_v33 = vld [vmem:[%s1818_s21 + $0x40] ss:$8 sps:$4 sm:$0xff]   ;;  %v1619_v35 = vld [vmem:[%s1818_s21 + $0x54] ss:$8 sps:$4 sm:$0xff]   ;;  %v1623_v37 = vld [vmem:[%s1818_s21 + $0x50] ss:$8 sps:$4 sm:$0xff]  }
  0x20   : > { %638 = vmatpush1.bf16.msra.mxu0 %v1583_v5  ;;  %1514 = vmatpush1.bf16.msra.mxu1 %v1583_v5  ;;  %v1618_v34 = vld [vmem:[%s1818_s21 + $0xc0] ss:$8 sps:$4 sm:$0xff]   ;;  %v1621_v36 = vld [vmem:[%s1818_s21 + $0xd4] ss:$8 sps:$4 sm:$0xff]   ;;  %v1624_v38 = vld [vmem:[%s1818_s21 + $0xd0] ss:$8 sps:$4 sm:$0xff]  }
  0x21   : > { %639 = vmatprep.subr.bf16.mxu0 %v1717_v1  ;;  %1505 = vmatprep.subr.bf16.mxu1 %v1717_v1  ;;  %v1625_v39 = vld [vmem:[%s1818_s21 + $0x64] ss:$8 sps:$4 sm:$0xff]   ;;  %v1629_v41 = vld [vmem:[%s1818_s21 + $0x60] ss:$8 sps:$4 sm:$0xff]   ;;  %v1631_v43 = vld [vmem:[%s1818_s21 + $0x74] ss:$8 sps:$4 sm:$0xff]  }
  0x22   : > { %v1627_v40 = vld [vmem:[%s1818_s21 + $0xe4] ss:$8 sps:$4 sm:$0xff]   ;;  %v1630_v42 = vld [vmem:[%s1818_s21 + $0xe0] ss:$8 sps:$4 sm:$0xff]   ;;  %v1633_v44 = vld [vmem:[%s1818_s21 + $0xf4] ss:$8 sps:$4 sm:$0xff]  }
  0x23   : > { %v1635_v45 = vld [vmem:[%s1818_s21 + $0x70] ss:$8 sps:$4 sm:$0xff]   ;;  %s1643_s11 = scalar_lea.vmem %s1642_s10, 4096 }
  0x24   : > { %640 = vmatpush1.bf16.msra.mxu0 %v1584_v8  ;;  %1515 = vmatpush1.bf16.msra.mxu1 %v1584_v8  ;;  %v1636_v46 = vld [vmem:[%s1818_s21 + $0xf0] ss:$8 sps:$4 sm:$0xff]   ;;  %s230_s21 = sand.u32 1, %s1699_s16  }
  0x25   : > { %641 = vmatprep.subr.bf16.mxu0 %v1717_v1  ;;  %1506 = vmatprep.subr.bf16.mxu1 %v1717_v1  ;;  %s1270_s24 = sshll.u32 %s230_s21, 7  ;;  %s1992_s18 = scalar_lea.sflag [#allocation4], %s230_s21 }
  0x26   : > { %s1909_s26 = scalar_lea.vmem [#allocation3], %s1270_s24 }
  0x27   : > { %s1173_s30 = sshll.u32 %s1909_s26, 4  ;;  %s1986_s30 = int_to_ptr.vmem [resolvable:$true] %s1173_s30 }
  0x28   : > { %642 = vmatpush1.bf16.msra.mxu0 %v1585_v9  ;;  %1516 = vmatpush1.bf16.msra.mxu1 %v1585_v9  ;;  %s1637_s8 = scalar_lea.vmem %s1986_s30, 2048  ;;  %p1644_p1 = scmp.lt.s32.totalorder %s1986_s30, %s1642_s10 }
  0x29   : > { %643 = vmatprep.subr.bf16.mxu0 %v1717_v1  ;;  %1507 = vmatprep.subr.bf16.mxu1 %v1717_v1  ;;  %p1638_p12 = scmp.ne.s32.totalorder %s1986_s30, %s1637_s8  ;;  %p1645_p2 = scmp.lt.s32.totalorder %s1643_s11, %s1637_s8 }
  0x2b   : > { %p1639_p13 = pnand %p1638_p12, %p1787_p4  ;;  %p1646_p3 = por %p1645_p2, %p1644_p1 }
  0x2c   : > { %644 = vmatpush1.bf16.msra.mxu0 %v1586_v10  ;;  %1517 = vmatpush1.bf16.msra.mxu1 %v1586_v10 }
  0x2d   : > { %645 = vmatprep.subr.bf16.mxu0 %v1717_v1  ;;  %1508 = vmatprep.subr.bf16.mxu1 %v1717_v1  ;;  %p1640_p0 = pneg %p1639_p13 }
  0x2f   : > { %p1647_p5 = pnand %p1646_p3, %p1640_p0 }
  0x30   : > { %646 = vmatpush1.bf16.msra.mxu0 %v1587_v13  ;;  %1518 = vmatpush1.bf16.msra.mxu1 %v1587_v13 }
  0x31   : > { %647 = vmatprep.subr.bf16.mxu0 %v1717_v1  ;;  %1509 = vmatprep.subr.bf16.mxu1 %v1717_v1 }
  0x34   : > { %648 = vmatpush1.bf16.msra.mxu0 %v627_v16  ;;  %1519 = vmatpush1.bf16.msra.mxu1 %v627_v16 }
  0x37   : > { %662 = vmatmul.mubr.bf16.vlgmr.msra.gmra.mrb[0].mxu0 %v1589_v17  ;;  %726 = vmatmul.mubr.bf16.vlgmr.msra.gmra.mrb[0].mxu1 %v1592_v18 }
  0x38   : > { %1317 = vmatprep.mubr.msk.bf16.mxu0 %vm573_vm0, %v1595_v19  ;;  %1325 = vmatprep.mubr.msk.bf16.mxu1 %vm573_vm0, %v1597_v20 }
  0x3f   : > { %670 = vmatmul.mubr.bf16.gmra.mrb[4].mxu0 %v1599_v21  ;;  %734 = vmatmul.mubr.bf16.gmra.mrb[4].mxu1 %v1600_v22 }
  0x40   : > { %1318 = vmatprep.mubr.msk.bf16.mxu0 %vm573_vm0, %v1601_v23  ;;  %1326 = vmatprep.mubr.msk.bf16.mxu1 %vm573_vm0, %v1603_v24 }
  0x47   : > { %678 = vmatmul.mubr.bf16.gmra.mrb[8].mxu0 %v1605_v25  ;;  %742 = vmatmul.mubr.bf16.gmra.mrb[8].mxu1 %v1606_v26 }
  0x48   : > { %1319 = vmatprep.mubr.msk.bf16.mxu0 %vm573_vm0, %v1607_v27  ;;  %1327 = vmatprep.mubr.msk.bf16.mxu1 %vm573_vm0, %v1609_v28 }
  0x4f   : > { %686 = vmatmul.mubr.bf16.gmra.mrb[12].mxu0 %v1611_v29  ;;  %750 = vmatmul.mubr.bf16.gmra.mrb[12].mxu1 %v1612_v30 }
  0x50   : > { %1320 = vmatprep.mubr.msk.bf16.mxu0 %vm573_vm0, %v1613_v31  ;;  %1328 = vmatprep.mubr.msk.bf16.mxu1 %vm573_vm0, %v1615_v32 }
  0x57   : > { %694 = vmatmul.mubr.bf16.gmra.mrb[16].mxu0 %v1617_v33  ;;  %758 = vmatmul.mubr.bf16.gmra.mrb[16].mxu1 %v1618_v34 }
  0x58   : > { %1321 = vmatprep.mubr.msk.bf16.mxu0 %vm573_vm0, %v1619_v35  ;;  %1329 = vmatprep.mubr.msk.bf16.mxu1 %vm573_vm0, %v1621_v36 }
  0x5f   : > { %702 = vmatmul.mubr.bf16.gmra.mrb[20].mxu0 %v1623_v37  ;;  %766 = vmatmul.mubr.bf16.gmra.mrb[20].mxu1 %v1624_v38 }
  0x60   : > { %1322 = vmatprep.mubr.msk.bf16.mxu0 %vm573_vm0, %v1625_v39  ;;  %1330 = vmatprep.mubr.msk.bf16.mxu1 %vm573_vm0, %v1627_v40 }
  0x67   : > { %710 = vmatmul.mubr.bf16.gmra.mrb[24].mxu0 %v1629_v41  ;;  %774 = vmatmul.mubr.bf16.gmra.mrb[24].mxu1 %v1630_v42 }
  0x68   : > { %1323 = vmatprep.mubr.msk.bf16.mxu0 %vm573_vm0, %v1631_v43  ;;  %1331 = vmatprep.mubr.msk.bf16.mxu1 %vm573_vm0, %v1633_v44 }
  0x6f   : > { %718 = vmatmul.mubr.bf16.gmra.mrb[28].mxu0 %v1635_v45  ;;  %782 = vmatmul.mubr.bf16.gmra.mrb[28].mxu1 %v1636_v46 }
 0x10a   : > { %v663_v48 = vpop.f32.mrb[0].mxu0  ;;  %v727_v50 = vpop.f32.mrb[0].mxu1 }
 0x10b   : > { %v896_v51 = vmul.f32 %v1889_v47, %v663_v48  ;;  %v912_v52 = vmul.f32 %v1889_v47, %v727_v50  ;;  %v665_v53 = vpop.f32.mrb[1].mxu0  ;;  %v729_v54 = vpop.f32.mrb[1].mxu1 }
 0x10c   : > { %v666_v55 = vpop.f32.mrb[2].mxu0  ;;  %v730_v56 = vpop.f32.mrb[2].mxu1 }
 0x10d   : > { %v935_v57 = vadd.f32 %v1894_v49, %v896_v51  ;;  %v951_v58 = vadd.f32 %v1894_v49, %v912_v52  ;;  %v897_v59 = vmul.f32 %v1889_v47, %v666_v55  ;;  %v913_v60 = vmul.f32 %v1889_v47, %v730_v56  ;;  %v668_v61 = vpop.f32.mrb[3].mxu0  ;;  %v732_v62 = vpop.f32.mrb[3].mxu1 }
 0x10f   : > { %v936_v63 = vadd.f32 %v1894_v49, %v897_v59  ;;  %v952_v0 = vadd.f32 %v1894_v49, %v913_v60  ;;  %v967_v1 = vmax.f32 %v935_v57, 0.0  ;;  %v983_v2 = vmax.f32 %v951_v58, 0.0 }
 0x111   : > { %v968_v3 = vmax.f32 %v936_v63, 0.0  ;;  %v984_v4 = vmax.f32 %v952_v0, 0.0 }
 0x112   : > { %v671_v5 = vpop.f32.mrb[4].mxu0  ;;  %v735_v6 = vpop.f32.mrb[4].mxu1 }
 0x113   : > { %v1408_v7 = vpack.c.bf16 %v968_v3, %v967_v1  ;;  %v1448_v8 = vpack.c.bf16 %v984_v4, %v983_v2  ;;  %v898_v9 = vmul.f32 %v1889_v47, %v671_v5  ;;  %v914_v10 = vmul.f32 %v1889_v47, %v735_v6  ;;  %v673_v11 = vpop.f32.mrb[5].mxu0  ;;  %v737_v12 = vpop.f32.mrb[5].mxu1 }
 0x114   : > { %v674_v13 = vpop.f32.mrb[6].mxu0  ;;  %v738_v14 = vpop.f32.mrb[6].mxu1 }
 0x115   : > { %1409 = vst [vmem:[%s1909_s26] sm:$0xff] %v1408_v7   ;;  %1492 = vst [vmem:[%s1909_s26 + $0x40] sm:$0xff] %v1448_v8   ;;  %v937_v15 = vadd.f32 %v1894_v49, %v898_v9  ;;  %v953_v16 = vadd.f32 %v1894_v49, %v914_v10  ;;  %v899_v17 = vmul.f32 %v1889_v47, %v674_v13  ;;  %v676_v19 = vpop.f32.mrb[7].mxu0  ;;  %v740_v20 = vpop.f32.mrb[7].mxu1 }
 0x116   : > { %v915_v18 = vmul.f32 %v1889_v47, %v738_v14 }
 0x117   : > { %v938_v21 = vadd.f32 %v1894_v49, %v899_v17  ;;  %v969_v23 = vmax.f32 %v937_v15, 0.0  ;;  %v985_v24 = vmax.f32 %v953_v16, 0.0 }
 0x118   : > { %v954_v22 = vadd.f32 %v1894_v49, %v915_v18 }
 0x119   : > { %v970_v25 = vmax.f32 %v938_v21, 0.0 }
 0x11a   : > { %v986_v26 = vmax.f32 %v954_v22, 0.0  ;;  %v679_v27 = vpop.f32.mrb[8].mxu0  ;;  %v743_v28 = vpop.f32.mrb[8].mxu1 }
 0x11b   : > { %v1413_v29 = vpack.c.bf16 %v970_v25, %v969_v23  ;;  %v900_v31 = vmul.f32 %v1889_v47, %v679_v27  ;;  %v916_v32 = vmul.f32 %v1889_v47, %v743_v28  ;;  %v681_v33 = vpop.f32.mrb[9].mxu0  ;;  %v745_v34 = vpop.f32.mrb[9].mxu1 }
 0x11c   : > { %v1453_v30 = vpack.c.bf16 %v986_v26, %v985_v24  ;;  %v682_v35 = vpop.f32.mrb[10].mxu0  ;;  %v746_v36 = vpop.f32.mrb[10].mxu1 }
 0x11d   : > { %1485 = vst [vmem:[%s1909_s26 + $0x8] sm:$0xff] %v1413_v29   ;;  %v939_v37 = vadd.f32 %v1894_v49, %v900_v31  ;;  %v955_v38 = vadd.f32 %v1894_v49, %v916_v32  ;;  %v901_v39 = vmul.f32 %v1889_v47, %v682_v35  ;;  %v917_v40 = vmul.f32 %v1889_v47, %v746_v36  ;;  %v684_v41 = vpop.f32.mrb[11].mxu0  ;;  %v748_v42 = vpop.f32.mrb[11].mxu1 }
 0x11e   : > { %1493 = vst [vmem:[%s1909_s26 + $0x48] sm:$0xff] %v1453_v30  }
 0x11f   : > { %v940_v43 = vadd.f32 %v1894_v49, %v901_v39  ;;  %v956_v44 = vadd.f32 %v1894_v49, %v917_v40  ;;  %v971_v45 = vmax.f32 %v939_v37, 0.0  ;;  %v987_v46 = vmax.f32 %v955_v38, 0.0 }
 0x121   : > { %v972_v48 = vmax.f32 %v940_v43, 0.0  ;;  %v988_v50 = vmax.f32 %v956_v44, 0.0 }
 0x122   : > { %v687_v51 = vpop.f32.mrb[12].mxu0  ;;  %v751_v52 = vpop.f32.mrb[12].mxu1 }
 0x123   : > { %v1418_v53 = vpack.c.bf16 %v972_v48, %v971_v45  ;;  %v1458_v54 = vpack.c.bf16 %v988_v50, %v987_v46  ;;  %v902_v55 = vmul.f32 %v1889_v47, %v687_v51  ;;  %v918_v56 = vmul.f32 %v1889_v47, %v751_v52  ;;  %v689_v57 = vpop.f32.mrb[13].mxu0  ;;  %v753_v58 = vpop.f32.mrb[13].mxu1 }
 0x124   : > { %v690_v59 = vpop.f32.mrb[14].mxu0  ;;  %v754_v60 = vpop.f32.mrb[14].mxu1 }
 0x125   : > { %1486 = vst [vmem:[%s1909_s26 + $0x10] sm:$0xff] %v1418_v53   ;;  %1494 = vst [vmem:[%s1909_s26 + $0x50] sm:$0xff] %v1458_v54   ;;  %v941_v61 = vadd.f32 %v1894_v49, %v902_v55  ;;  %v957_v62 = vadd.f32 %v1894_v49, %v918_v56  ;;  %v903_v63 = vmul.f32 %v1889_v47, %v690_v59  ;;  %v692_v1 = vpop.f32.mrb[15].mxu0  ;;  %v756_v2 = vpop.f32.mrb[15].mxu1 }
 0x126   : > { %v919_v0 = vmul.f32 %v1889_v47, %v754_v60 }
 0x127   : > { %v942_v3 = vadd.f32 %v1894_v49, %v903_v63  ;;  %v973_v5 = vmax.f32 %v941_v61, 0.0  ;;  %v989_v6 = vmax.f32 %v957_v62, 0.0 }
 0x128   : > { %v958_v4 = vadd.f32 %v1894_v49, %v919_v0 }
 0x129   : > { %v974_v7 = vmax.f32 %v942_v3, 0.0 }
 0x12a   : > { %v990_v8 = vmax.f32 %v958_v4, 0.0  ;;  %v695_v9 = vpop.f32.mrb[16].mxu0  ;;  %v759_v10 = vpop.f32.mrb[16].mxu1 }
 0x12b   : > { %v1423_v11 = vpack.c.bf16 %v974_v7, %v973_v5  ;;  %v904_v13 = vmul.f32 %v1889_v47, %v695_v9  ;;  %v920_v14 = vmul.f32 %v1889_v47, %v759_v10  ;;  %v697_v15 = vpop.f32.mrb[17].mxu0  ;;  %v761_v16 = vpop.f32.mrb[17].mxu1 }
 0x12c   : > { %v1463_v12 = vpack.c.bf16 %v990_v8, %v989_v6  ;;  %v698_v17 = vpop.f32.mrb[18].mxu0  ;;  %v762_v18 = vpop.f32.mrb[18].mxu1 }
 0x12d   : > { %1487 = vst [vmem:[%s1909_s26 + $0x18] sm:$0xff] %v1423_v11   ;;  %v943_v19 = vadd.f32 %v1894_v49, %v904_v13  ;;  %v959_v20 = vadd.f32 %v1894_v49, %v920_v14  ;;  %v905_v21 = vmul.f32 %v1889_v47, %v698_v17  ;;  %v921_v22 = vmul.f32 %v1889_v47, %v762_v18  ;;  %v700_v23 = vpop.f32.mrb[19].mxu0  ;;  %v764_v24 = vpop.f32.mrb[19].mxu1 }
 0x12e   : > { %1495 = vst [vmem:[%s1909_s26 + $0x58] sm:$0xff] %v1463_v12  }
 0x12f   : > { %v944_v25 = vadd.f32 %v1894_v49, %v905_v21  ;;  %v960_v26 = vadd.f32 %v1894_v49, %v921_v22  ;;  %v975_v27 = vmax.f32 %v943_v19, 0.0  ;;  %v991_v28 = vmax.f32 %v959_v20, 0.0 }
 0x131   : > { %v976_v29 = vmax.f32 %v944_v25, 0.0  ;;  %v992_v30 = vmax.f32 %v960_v26, 0.0 }
 0x132   : > { %v703_v31 = vpop.f32.mrb[20].mxu0  ;;  %v767_v32 = vpop.f32.mrb[20].mxu1 }
 0x133   : > { %v1428_v33 = vpack.c.bf16 %v976_v29, %v975_v27  ;;  %v1468_v34 = vpack.c.bf16 %v992_v30, %v991_v28  ;;  %v906_v35 = vmul.f32 %v1889_v47, %v703_v31  ;;  %v922_v36 = vmul.f32 %v1889_v47, %v767_v32  ;;  %v705_v37 = vpop.f32.mrb[21].mxu0  ;;  %v769_v38 = vpop.f32.mrb[21].mxu1 }
 0x134   : > { %v706_v39 = vpop.f32.mrb[22].mxu0  ;;  %v770_v40 = vpop.f32.mrb[22].mxu1 }
 0x135   : > { %1488 = vst [vmem:[%s1909_s26 + $0x20] sm:$0xff] %v1428_v33   ;;  %1496 = vst [vmem:[%s1909_s26 + $0x60] sm:$0xff] %v1468_v34   ;;  %v945_v41 = vadd.f32 %v1894_v49, %v906_v35  ;;  %v961_v42 = vadd.f32 %v1894_v49, %v922_v36  ;;  %v907_v43 = vmul.f32 %v1889_v47, %v706_v39  ;;  %v708_v45 = vpop.f32.mrb[23].mxu0  ;;  %v772_v46 = vpop.f32.mrb[23].mxu1 }
 0x136   : > { %v923_v44 = vmul.f32 %v1889_v47, %v770_v40 }
 0x137   : > { %v946_v48 = vadd.f32 %v1894_v49, %v907_v43  ;;  %v977_v51 = vmax.f32 %v945_v41, 0.0  ;;  %v993_v52 = vmax.f32 %v961_v42, 0.0 }
 0x138   : > { %v962_v50 = vadd.f32 %v1894_v49, %v923_v44 }
 0x139   : > { %v978_v53 = vmax.f32 %v946_v48, 0.0 }
 0x13a   : > { %v994_v54 = vmax.f32 %v962_v50, 0.0  ;;  %v711_v55 = vpop.f32.mrb[24].mxu0  ;;  %v775_v56 = vpop.f32.mrb[24].mxu1 }
 0x13b   : > { %v1433_v57 = vpack.c.bf16 %v978_v53, %v977_v51  ;;  %v908_v59 = vmul.f32 %v1889_v47, %v711_v55  ;;  %v924_v60 = vmul.f32 %v1889_v47, %v775_v56  ;;  %v713_v61 = vpop.f32.mrb[25].mxu0  ;;  %v777_v62 = vpop.f32.mrb[25].mxu1 }
 0x13c   : > { %v1473_v58 = vpack.c.bf16 %v994_v54, %v993_v52  ;;  %v714_v63 = vpop.f32.mrb[26].mxu0  ;;  %v778_v0 = vpop.f32.mrb[26].mxu1 }
 0x13d   : > { %1489 = vst [vmem:[%s1909_s26 + $0x28] sm:$0xff] %v1433_v57   ;;  %v947_v1 = vadd.f32 %v1894_v49, %v908_v59  ;;  %v963_v2 = vadd.f32 %v1894_v49, %v924_v60  ;;  %v909_v3 = vmul.f32 %v1889_v47, %v714_v63  ;;  %v925_v4 = vmul.f32 %v1889_v47, %v778_v0  ;;  %v716_v5 = vpop.f32.mrb[27].mxu0  ;;  %v780_v6 = vpop.f32.mrb[27].mxu1 }
 0x13e   : > { %1497 = vst [vmem:[%s1909_s26 + $0x68] sm:$0xff] %v1473_v58  }
 0x13f   : > { %v948_v7 = vadd.f32 %v1894_v49, %v909_v3  ;;  %v964_v8 = vadd.f32 %v1894_v49, %v925_v4  ;;  %v979_v9 = vmax.f32 %v947_v1, 0.0  ;;  %v995_v10 = vmax.f32 %v963_v2, 0.0 }
 0x141   : > { %v980_v11 = vmax.f32 %v948_v7, 0.0  ;;  %v996_v12 = vmax.f32 %v964_v8, 0.0 }
 0x142   : > { %v719_v13 = vpop.f32.mrb[28].mxu0  ;;  %v783_v14 = vpop.f32.mrb[28].mxu1 }
 0x143   : > { %v1438_v15 = vpack.c.bf16 %v980_v11, %v979_v9  ;;  %v1478_v16 = vpack.c.bf16 %v996_v12, %v995_v10  ;;  %v910_v17 = vmul.f32 %v1889_v47, %v719_v13  ;;  %v926_v18 = vmul.f32 %v1889_v47, %v783_v14  ;;  %v721_v19 = vpop.f32.mrb[29].mxu0  ;;  %v785_v20 = vpop.f32.mrb[29].mxu1 }
 0x144   : > { %v722_v21 = vpop.f32.mrb[30].mxu0  ;;  %v786_v22 = vpop.f32.mrb[30].mxu1 }
 0x145   : > { %1490 = vst [vmem:[%s1909_s26 + $0x30] sm:$0xff] %v1438_v15   ;;  %1498 = vst [vmem:[%s1909_s26 + $0x70] sm:$0xff] %v1478_v16   ;;  %v949_v23 = vadd.f32 %v1894_v49, %v910_v17  ;;  %v965_v24 = vadd.f32 %v1894_v49, %v926_v18  ;;  %v911_v25 = vmul.f32 %v1889_v47, %v722_v21  ;;  %v724_v27 = vpop.f32.mrb[31].mxu0  ;;  %v788_v28 = vpop.f32.mrb[31].mxu1 }
 0x146   : > { %v927_v26 = vmul.f32 %v1889_v47, %v786_v22 }
 0x147   : > { %v950_v29 = vadd.f32 %v1894_v49, %v911_v25  ;;  %v981_v31 = vmax.f32 %v949_v23, 0.0  ;;  %v997_v32 = vmax.f32 %v965_v24, 0.0 }
 0x148   : > { %v966_v30 = vadd.f32 %v1894_v49, %v927_v26 }
 0x149   : > { %v982_v33 = vmax.f32 %v950_v29, 0.0 }
 0x14a   : > { %v998_v34 = vmax.f32 %v966_v30, 0.0 }
 0x14b   : > { %v1443_v47 = vpack.c.bf16 %v982_v33, %v981_v31 }
 0x14c   : > { %v1483_v35 = vpack.c.bf16 %v998_v34, %v997_v32 }
 0x14d   : > { %1491 = vst [vmem:[%s1909_s26 + $0x38] sm:$0xff] %v1443_v47  }
 0x14e   : > { %1499 = vst [vmem:[%s1909_s26 + $0x78] sm:$0xff] %v1483_v35  }
 0x14f   : > { %1650 = shalt.err (!%p1647_p5)
}
 0x150   : > { %s1651_s12 = scalar_lea.hbm %s1984_s7, 2048  ;;  %s1655_s22 = scalar_lea.hbm %s2042_s4, 4096 }
 0x151   : > { %p1652_p6 = scmp.ne.s32.totalorder %s1984_s7, %s1651_s12  ;;  %p1656_p10 = scmp.lt.u32.totalorder %s1984_s7, %s2042_s4 }
 0x152   : > { %p1657_p11 = scmp.lt.u32.totalorder %s1655_s22, %s1651_s12  ;;  %p1659_p13 = scmp.lt.u32.totalorder %s1651_s12, %s1984_s7 }
 0x153   : > { %p1653_p7 = pnand %p1652_p6, %p1787_p4 }
 0x154   : > { %p1658_p12 = por %p1657_p11, %p1656_p10 }
 0x155   : > { %p1654_p9 = pneg %p1653_p7 }
 0x156   : > { %p1660_p0 = por %p1659_p13, %p1658_p12 }
 0x158   : > { %p1661_p1 = pnand %p1660_p0, %p1654_p9 }
 0x15a   : > { %1664 = shalt.err (!%p1661_p1)
}
 0x15b   : > { %s1720_s26 = smov 64   ;;  %s1721_s29 = smov 4  }
 0x15c   : > { %1520 = dma.vmem_to_hbm [thread:$0]  (%p1787_p4), %s1986_s30, 2048, %s1984_s7, %s1992_s18, %s1720_s26, %s1720_s26, %s1721_s29  }
 0x15d PF: > { %p1526_p2 = scmp.ge.s32.totalorder %s1715_s20, 2  ;;  %s1188_s5 = sand.u32 1, %s1695_s15  }
 0x15e   : > { %s1189_s6 = scalar_lea.sflag [#allocation4], %s1188_s5 }
 0x15f   : > { %p1523_p3 = pnand %p1526_p2, %p1794_p8 }
 0x161   : > { %1690 = dma.done.wait (!%p1523_p3), %s1189_s6, 2048  }
 0x162   : > { %1692 = vsyncadd (!%p1523_p3), %s1189_s6, 4294965248  ;;  %s17_s20 = sadd.s32 1, %s1715_s20   ;;  %s2045_s15 = smov %s1699_s16 }
 0x163   : > { %p14_p5 = scmp.ge.s32.totalorder %s17_s20, 4   ;;  %s2046_s16 = smov %s1703_s17 }
 0x164   : > { %s2047_s17 = smov %s1800_s28  ;;  %s2048_s18 = smov %s1711_s19 }
 0x165   : > { %s2049_s19 = smov %s2051_s23  ;;  %16 = sbr.rel (!%p14_p5) target bundleno = 4 (0x4), region = 82 }
 0x16c   :  { %1194 = vsyncpa [#allocation4], 1 }
 0x16d   :  { %1196 = vsyncpa [#allocation4 + $0x1], 1 }

</bundles_post_ra>
